<compile_context>
chip_gen: v7x
topology: tpu7x:2x2x1
jax: 0.10.0
libtpu: 0.0.40
codegen_flags: <defaults>
</compile_context>

<pallas_src>
import functools

import jax
import jax.numpy as jnp
import numpy as np
from jax.experimental import pallas as pl
from jax.experimental.pallas import tpu as pltpu

_BN_EPS = 1e-3
_VMEM_LIMIT = 32 * 1024 * 1024  # safe cap on v5e/v6e/v7x; tiles use ~3-8 MiB


def _round_up(x, m):
    return ((x + m - 1) // m) * m


def _pick_tile_m(m):
    """Sublane-dim tile: multiple of 16 (bf16 native) <= m, capped at 256."""
    if m < 16:
        return m                      # equals full dim -> allowed
    return min(256, (m // 16) * 16)


def _pick_tile_n(n):
    """Lane-dim tile: multiple of 128 <= n, capped at 256."""
    if n < 128:
        return n                      # equals full dim -> allowed
    return min(256, (n // 128) * 128)


def _pick_tile_k(kp, cap=1024):
    """Largest multiple of 128 that divides kp (kp % 128 == 0) and is <= cap."""
    if kp <= cap:
        return kp
    q = kp // 128
    best = 128
    for d in range(1, q + 1):
        if q % d == 0 and 128 * d <= cap:
            best = 128 * d
    return best


# ----------------------------------------------------------------------------
# Pallas kernels
# ----------------------------------------------------------------------------
def _mm_bias_act_kernel(a_ref, b_ref, bias_ref, o_ref, acc_ref, *, relu):
    """out = act(A @ B + bias): bf16 MXU inputs, f32 accumulation over K grid."""
    @pl.when(pl.program_id(2) == 0)
    def _():
        acc_ref[...] = jnp.zeros_like(acc_ref)

    acc_ref[...] += jnp.dot(a_ref[...], b_ref[...],
                            preferred_element_type=jnp.float32)

    @pl.when(pl.program_id(2) == pl.num_programs(2) - 1)
    def _():
        r = acc_ref[...] + bias_ref[...]
        if relu:
            r = jnp.maximum(r, 0.0)
        o_ref[...] = r.astype(o_ref.dtype)


def pallas_matmul_bias(a, b, bias, relu, out_dtype):
    """act((M,K) @ (Kp,N) + bias[N]) with a tiled Pallas kernel.

    `b` is pre-folded, zero-padded along K to Kp (a multiple of 128) and cast
    to bf16; `bias` is f32 of shape (1, N).  `a` is zero-padded along K only
    and cast to bf16 here; M and N use pl.cdiv grids with masked partial edge
    blocks (no M/N padding, no output slice copy).
    """
    M, K = a.shape
    Kp, N = b.shape
    assert Kp % 128 == 0 and Kp >= K
    if Kp > K:
        a = jnp.pad(a, ((0, 0), (0, Kp - K)))   # K must be exactly zero-padded
    a = a.astype(jnp.bfloat16)

    tm = _pick_tile_m(M)
    tn = _pick_tile_n(N)
    tk = _pick_tile_k(Kp)

    return pl.pallas_call(
        functools.partial(_mm_bias_act_kernel, relu=relu),
        out_shape=jax.ShapeDtypeStruct((M, N), out_dtype),
        grid_spec=pltpu.PrefetchScalarGridSpec(
            num_scalar_prefetch=0,
            grid=(pl.cdiv(M, tm), pl.cdiv(N, tn), Kp // tk),
            in_specs=[
                pl.BlockSpec((tm, tk), lambda i, j, k: (i, k)),
                pl.BlockSpec((tk, tn), lambda i, j, k: (k, j)),
                pl.BlockSpec((1, tn), lambda i, j, k: (0, j)),
            ],
            out_specs=pl.BlockSpec((tm, tn), lambda i, j, k: (i, j)),
            scratch_shapes=[pltpu.VMEM((tm, tn), jnp.float32)],
        ),
        compiler_params=pltpu.CompilerParams(
            dimension_semantics=("parallel", "parallel", "arbitrary"),
            vmem_limit_bytes=_VMEM_LIMIT),
    )(a, b, bias)


def _pool_max_kernel(x_ref, o_ref):
    acc = x_ref[0]
    for i in range(1, 9):
        acc = jnp.maximum(acc, x_ref[i])
    o_ref[...] = acc


def max_pool_3x3_s2(x):
    """F.max_pool2d(x, 3, stride=2) on NHWC (bf16), gridded over output rows."""
    N, H, W, C = x.shape
    Ho = (H - 3) // 2 + 1
    Wo = (W - 3) // 2 + 1
    M = N * Ho * Wo
    # TODO(synk): the 9 shifted taps are still gathered by XLA strided slices;
    # an in-kernel shifted-read pool would avoid the small duplicated read.
    taps = [x[:, i:i + 2 * (Ho - 1) + 1:2,
                 j:j + 2 * (Wo - 1) + 1:2, :].reshape(M, C)
            for i in range(3) for j in range(3)]
    stacked = jnp.stack(taps, axis=0)  # (9, M, C)
    tm = _pick_tile_m(M)
    out = pl.pallas_call(
        _pool_max_kernel,
        out_shape=jax.ShapeDtypeStruct((M, C), x.dtype),
        grid_spec=pltpu.PrefetchScalarGridSpec(
            num_scalar_prefetch=0,
            grid=(pl.cdiv(M, tm),),
            in_specs=[pl.BlockSpec((9, tm, C), lambda m: (0, m, 0))],
            out_specs=pl.BlockSpec((tm, C), lambda m: (m, 0)),
        ),
        compiler_params=pltpu.CompilerParams(
            dimension_semantics=("parallel",),
            vmem_limit_bytes=_VMEM_LIMIT),
    )(stacked)
    return out.reshape(N, Ho, Wo, C)


# ----------------------------------------------------------------------------
# Glue: im2col, deterministic synthetic parameters, folded conv helpers
# ----------------------------------------------------------------------------
def im2col(x, kh, kw, stride, pad_h, pad_w):
    N, H, W, C = x.shape
    if pad_h or pad_w:
        x = jnp.pad(x, ((0, 0), (pad_h, pad_h), (pad_w, pad_w), (0, 0)))
    Hp, Wp = H + 2 * pad_h, W + 2 * pad_w
    Ho = (Hp - kh) // stride + 1
    Wo = (Wp - kw) // stride + 1
    cols = [x[:, i:i + stride * (Ho - 1) + 1:stride,
                 j:j + stride * (Wo - 1) + 1:stride, :]
            for i in range(kh) for j in range(kw)]
    p = jnp.stack(cols, axis=3)  # (N, Ho, Wo, kh*kw, C)
    return p.reshape(N * Ho * Wo, kh * kw * C), Ho, Wo


class ParamGen:
    """Deterministic synthetic parameters (no checkpoint loading)."""

    def __init__(self, key):
        self.key = key
        self.count = 0

    def _k(self):
        self.count += 1
        return jax.random.fold_in(self.key, self.count)

    def conv_w(self, cin, cout, kh, kw):
        fan_in = cin * kh * kw
        return jax.random.normal(self._k(), (kh, kw, cin, cout),
                                 jnp.float32) / np.sqrt(fan_in)

    def bn(self, c):
        g = 1.0 + 0.1 * jax.random.normal(self._k(), (c,), jnp.float32)
        b = 0.1 * jax.random.normal(self._k(), (c,), jnp.float32)
        m = 0.1 * jax.random.normal(self._k(), (c,), jnp.float32)
        v = 1.0 + 0.1 * jax.random.uniform(self._k(), (c,), jnp.float32)
        return g, b, m, v

    def linear(self, cin, cout):
        w = jax.random.normal(self._k(), (cin, cout),
                              jnp.float32) / np.sqrt(cin)
        b = 0.01 * jax.random.normal(self._k(), (cout,), jnp.float32)
        return w, b


def _fold_bn(w, bn):
    """Fold inference BN into conv weights -> ((kh*kw*cin, cout) f32, (cout,) f32)."""
    gamma, beta, mean, var = bn
    s = gamma / jnp.sqrt(var + _BN_EPS)
    w_fold = (w * s).reshape(-1, w.shape[-1])
    bias = beta - mean * s
    return w_fold, bias


def _pack_weights(w_fold, bias):
    """Hoisted weight prep: zero-pad K to a multiple of 128, cast to bf16."""
    K, N = w_fold.shape
    Kp = _round_up(K, 128)
    w_p = jnp.pad(w_fold, ((0, Kp - K), (0, 0))).astype(jnp.bfloat16)
    return w_p, bias.reshape(1, N).astype(jnp.float32)


def basic_conv(pg, x, cin, cout, kh, kw, stride=1, pad=(0, 0)):
    """BasicConv2d = Conv2d(bias=False) + BatchNorm2d(eps=1e-3) + ReLU."""
    assert x.shape[-1] == cin
    w_p, bias_p = _pack_weights(*_fold_bn(pg.conv_w(cin, cout, kh, kw),
                                          pg.bn(cout)))
    patches, Ho, Wo = im2col(x, kh, kw, stride, pad[0], pad[1])
    y = pallas_matmul_bias(patches, w_p, bias_p, relu=True,
                           out_dtype=jnp.bfloat16)
    return y.reshape(x.shape[0], Ho, Wo, cout)


def fused_1x1_heads(pg, x, cin, couts):
    """Parallel BasicConv2d(1x1) branches on the same input fused into one
    matmul by concatenating the BN-folded weights/biases along N."""
    assert x.shape[-1] == cin
    folds = [_fold_bn(pg.conv_w(cin, c, 1, 1), pg.bn(c)) for c in couts]
    w_fold = jnp.concatenate([w for w, _ in folds], axis=1)
    bias = jnp.concatenate([b for _, b in folds], axis=0)
    w_p, bias_p = _pack_weights(w_fold, bias)
    N, H, W, _ = x.shape
    y = pallas_matmul_bias(x.reshape(N * H * W, cin), w_p, bias_p,
                           relu=True, out_dtype=jnp.bfloat16)
    outs, off = [], 0
    for c in couts:
        outs.append(y[:, off:off + c].reshape(N, H, W, c))
        off += c
    return outs


def pool_branch(pg, x, cin, cout):
    """avg_pool2d(3,1,pad=1,count_include_pad=True) + BasicConv2d(1x1) folded
    into a single 3x3 conv (pool is linear: tile the 1x1 weight / 9)."""
    assert x.shape[-1] == cin
    w1 = pg.conv_w(cin, cout, 1, 1)
    w3 = jnp.tile(w1, (3, 3, 1, 1)) / 9.0
    w_p, bias_p = _pack_weights(*_fold_bn(w3, pg.bn(cout)))
    patches, Ho, Wo = im2col(x, 3, 3, 1, 1, 1)
    y = pallas_matmul_bias(patches, w_p, bias_p, relu=True,
                           out_dtype=jnp.bfloat16)
    return y.reshape(x.shape[0], Ho, Wo, cout)


# ----------------------------------------------------------------------------
# Inception blocks (torchvision layout / concat order)
# ----------------------------------------------------------------------------
def inception_a(pg, x, cin, pool_features):
    b1, b5, b3 = fused_1x1_heads(pg, x, cin, [64, 48, 64])
    b5 = basic_conv(pg, b5, 48, 64, 5, 5, pad=(2, 2))
    b3 = basic_conv(pg, b3, 64, 96, 3, 3, pad=(1, 1))
    b3 = basic_conv(pg, b3, 96, 96, 3, 3, pad=(1, 1))
    bp = pool_branch(pg, x, cin, pool_features)
    return jnp.concatenate([b1, b5, b3, bp], axis=-1)


def inception_b(pg, x, cin):
    b3 = basic_conv(pg, x, cin, 384, 3, 3, stride=2)
    bd = basic_conv(pg, x, cin, 64, 1, 1)
    bd = basic_conv(pg, bd, 64, 96, 3, 3, pad=(1, 1))
    bd = basic_conv(pg, bd, 96, 96, 3, 3, stride=2)
    bp = max_pool_3x3_s2(x)
    return jnp.concatenate([b3, bd, bp], axis=-1)


def inception_c(pg, x, cin, c7):
    b1, b7, bd = fused_1x1_heads(pg, x, cin, [192, c7, c7])
    b7 = basic_conv(pg, b7, c7, c7, 1, 7, pad=(0, 3))
    b7 = basic_conv(pg, b7, c7, 192, 7, 1, pad=(3, 0))
    bd = basic_conv(pg, bd, c7, c7, 7, 1, pad=(3, 0))
    bd = basic_conv(pg, bd, c7, c7, 1, 7, pad=(0, 3))
    bd = basic_conv(pg, bd, c7, c7, 7, 1, pad=(3, 0))
    bd = basic_conv(pg, bd, c7, 192, 1, 7, pad=(0, 3))
    bp = pool_branch(pg, x, cin, 192)
    return jnp.concatenate([b1, b7, bd, bp], axis=-1)


def inception_d(pg, x, cin):
    b3, b7 = fused_1x1_heads(pg, x, cin, [192, 192])
    b3 = basic_conv(pg, b3, 192, 320, 3, 3, stride=2)
    b7 = basic_conv(pg, b7, 192, 192, 1, 7, pad=(0, 3))
    b7 = basic_conv(pg, b7, 192, 192, 7, 1, pad=(3, 0))
    b7 = basic_conv(pg, b7, 192, 192, 3, 3, stride=2)
    bp = max_pool_3x3_s2(x)
    return jnp.concatenate([b3, b7, bp], axis=-1)


def inception_e(pg, x, cin):
    b1, b3, bd = fused_1x1_heads(pg, x, cin, [320, 384, 448])
    b3a = basic_conv(pg, b3, 384, 384, 1, 3, pad=(0, 1))
    b3b = basic_conv(pg, b3, 384, 384, 3, 1, pad=(1, 0))
    b3 = jnp.concatenate([b3a, b3b], axis=-1)
    bd = basic_conv(pg, bd, 448, 384, 3, 3, pad=(1, 1))
    bda = basic_conv(pg, bd, 384, 384, 1, 3, pad=(0, 1))
    bdb = basic_conv(pg, bd, 384, 384, 3, 1, pad=(1, 0))
    bd = jnp.concatenate([bda, bdb], axis=-1)
    bp = pool_branch(pg, x, cin, 192)
    return jnp.concatenate([b1, b3, bd, bp], axis=-1)


# ----------------------------------------------------------------------------
# Full InceptionV3 forward
# ----------------------------------------------------------------------------
def inception_v3_forward(x_nchw, num_classes, param_key):
    pg = ParamGen(param_key)
    x = x_nchw.astype(jnp.float32)

    # transform_input=True (implied by weights=True in torchvision)
    ch0 = x[:, 0:1] * (0.229 / 0.5) + (0.485 - 0.5) / 0.5
    ch1 = x[:, 1:2] * (0.224 / 0.5) + (0.456 - 0.5) / 0.5
    ch2 = x[:, 2:3] * (0.225 / 0.5) + (0.406 - 0.5) / 0.5
    x = jnp.concatenate([ch0, ch1, ch2], axis=1)

    # NCHW -> NHWC, bf16 activations from here on (f32 accumulation in-kernel)
    x = jnp.transpose(x, (0, 2, 3, 1)).astype(jnp.bfloat16)

    # Stem
    x = basic_conv(pg, x, 3, 32, 3, 3, stride=2)        # Conv2d_1a_3x3
    x = basic_conv(pg, x, 32, 32, 3, 3)                  # Conv2d_2a_3x3
    x = basic_conv(pg, x, 32, 64, 3, 3, pad=(1, 1))      # Conv2d_2b_3x3
    x = max_pool_3x3_s2(x)                                # maxpool1
    x = basic_conv(pg, x, 64, 80, 1, 1)                   # Conv2d_3b_1x1
    x = basic_conv(pg, x, 80, 192, 3, 3)                  # Conv2d_4a_3x3
    x = max_pool_3x3_s2(x)                                # maxpool2

    # Inception blocks
    x = inception_a(pg, x, 192, 32)    # Mixed_5b
    x = inception_a(pg, x, 256, 64)    # Mixed_5c
    x = inception_a(pg, x, 288, 64)    # Mixed_5d
    x = inception_b(pg, x, 288)        # Mixed_6a
    x = inception_c(pg, x, 768, 128)   # Mixed_6b
    x = inception_c(pg, x, 768, 160)   # Mixed_6c
    x = inception_c(pg, x, 768, 160)   # Mixed_6d
    x = inception_c(pg, x, 768, 192)   # Mixed_6e
    # TODO(synk): AuxLogits branch not computed (aux_logits=False / eval mode).
    x = inception_d(pg, x, 768)        # Mixed_7a
    x = inception_e(pg, x, 1280)       # Mixed_7b
    x = inception_e(pg, x, 2048)       # Mixed_7c

    # AdaptiveAvgPool2d((1,1)) + Dropout(eval identity) + Flatten + fc
    x = jnp.mean(x.astype(jnp.float32), axis=(1, 2))     # (N, 2048)
    w_fc, b_fc = pg.linear(2048, num_classes)             # K=2048 is 128-aligned
    logits = pallas_matmul_bias(x, w_fc.astype(jnp.bfloat16),
                                b_fc.reshape(1, -1), relu=False,
                                out_dtype=jnp.float32)
    return logits


if __name__ == "__main__":
    key = jax.random.PRNGKey(0)
    x_key, p_key = jax.random.split(key)

    # 75x75 is the minimum spatial size admitted by InceptionV3's valid/stride-2
    # conv stack; batch=2, 3 input channels (RGB), num_classes=10.
    batch, num_classes = 2, 10
    x = jax.random.normal(x_key, (batch, 3, 75, 75), jnp.float32)

    logits = inception_v3_forward(x, num_classes, p_key)
    logits = jax.block_until_ready(logits)

    assert logits.shape == (batch, num_classes)
    assert bool(jnp.all(jnp.isfinite(logits)))
    print("KERNEL_OK")
</pallas_src>

<mosaic_0001>
module attributes {stable_mosaic.version = 11 : i64} {
  func.func @_mm_bias_act_kernel(%arg0: i32, %arg1: i32, %arg2: i32, %arg3: memref<256x128xbf16, #tpu.memory_space<vmem>>, %arg4: memref<128x32xbf16, #tpu.memory_space<vmem>>, %arg5: memref<1x32xf32, #tpu.memory_space<vmem>>, %arg6: memref<256x32xbf16, #tpu.memory_space<vmem>>, %arg7: memref<256x32xf32, #tpu.memory_space<vmem>>) attributes {dimension_semantics = [#tpu.dimension_semantics<parallel>, #tpu.dimension_semantics<parallel>, #tpu.dimension_semantics<arbitrary>], iteration_bounds = array<i64: 11, 1, 1>, scalar_prefetch = 0 : i64, scratch_operands = 1 : i64, tpu.core_type = #tpu.core_type<tc>, window_params = [{transform_indices = @transform_0, window_bounds = array<i64: 256, 128>}, {transform_indices = @transform_1, window_bounds = array<i64: 128, 32>}, {transform_indices = @transform_2, window_bounds = array<i64: 1, 32>}, {transform_indices = @transform_3, window_bounds = array<i64: 256, 32>}]} {
    %c0_i32 = arith.constant 0 : i32
    %0 = arith.cmpi eq, %arg2, %c0_i32 : i32
    %1 = arith.extui %0 : i1 to i32
    %c0_i32_0 = arith.constant 0 : i32
    %2 = arith.cmpi ne, %1, %c0_i32_0 : i32
    scf.if %2 {
      %cst_10 = arith.constant 0.000000e+00 : f32
      %12 = vector.broadcast %cst_10 : f32 to vector<256x32xf32>
      %c0_11 = arith.constant 0 : index
      %c0_12 = arith.constant 0 : index
      %13 = vector.load %arg7[%c0_11, %c0_12] : memref<256x32xf32, #tpu.memory_space<vmem>>, vector<256x32xf32>
      tpu.vector_store %arg7[%c0_11, %c0_12], %12 {strides = array<i32>} : memref<256x32xf32, #tpu.memory_space<vmem>>, vector<256x32xf32>,
    } else {
    }
    %c0 = arith.constant 0 : index
    %c0_1 = arith.constant 0 : index
    %3 = vector.load %arg7[%c0, %c0_1] : memref<256x32xf32, #tpu.memory_space<vmem>>, vector<256x32xf32>
    %c0_2 = arith.constant 0 : index
    %c0_3 = arith.constant 0 : index
    %4 = vector.load %arg3[%c0_2, %c0_3] : memref<256x128xbf16, #tpu.memory_space<vmem>>, vector<256x128xbf16>
    %c0_4 = arith.constant 0 : index
    %c0_5 = arith.constant 0 : index
    %5 = vector.load %arg4[%c0_4, %c0_5] : memref<128x32xbf16, #tpu.memory_space<vmem>>, vector<128x32xbf16>
    %cst = arith.constant dense<0.000000e+00> : vector<256x32xf32>
    %6 = tpu.matmul %4, %5, %cst {dimension_numbers = #tpu.dot_dimension_numbers<[1], [0], [0], [1], [0, 0, 1, 1], [], []>} : vector<256x128xbf16>, vector<128x32xbf16>, vector<256x32xf32> -> vector<256x32xf32>
    %7 = arith.addf %3, %6 : vector<256x32xf32>
    %c0_6 = arith.constant 0 : index
    %c0_7 = arith.constant 0 : index
    %8 = vector.load %arg7[%c0_6, %c0_7] : memref<256x32xf32, #tpu.memory_space<vmem>>, vector<256x32xf32>
    tpu.vector_store %arg7[%c0_6, %c0_7], %7 {strides = array<i32>} : memref<256x32xf32, #tpu.memory_space<vmem>>, vector<256x32xf32>,
    %c0_i32_8 = arith.constant 0 : i32
    %9 = arith.cmpi eq, %arg2, %c0_i32_8 : i32
    %10 = arith.extui %9 : i1 to i32
    %c0_i32_9 = arith.constant 0 : i32
    %11 = arith.cmpi ne, %10, %c0_i32_9 : i32
    scf.if %11 {
      %c0_10 = arith.constant 0 : index
      %c0_11 = arith.constant 0 : index
      %12 = vector.load %arg7[%c0_10, %c0_11] : memref<256x32xf32, #tpu.memory_space<vmem>>, vector<256x32xf32>
      %c0_12 = arith.constant 0 : index
      %c0_13 = arith.constant 0 : index
      %13 = vector.load %arg5[%c0_12, %c0_13] : memref<1x32xf32, #tpu.memory_space<vmem>>, vector<1x32xf32>
      %14 = vector.broadcast %13 : vector<1x32xf32> to vector<256x32xf32>
      %15 = arith.addf %12, %14 : vector<256x32xf32>
      %cst_14 = arith.constant 0.000000e+00 : f32
      %16 = vector.broadcast %cst_14 : f32 to vector<256x32xf32>
      %17 = arith.maximumf %15, %16 : vector<256x32xf32>
      %18 = arith.truncf %17 : vector<256x32xf32> to vector<256x32xbf16>
      %c0_15 = arith.constant 0 : index
      %c0_16 = arith.constant 0 : index
      %19 = vector.load %arg6[%c0_15, %c0_16] : memref<256x32xbf16, #tpu.memory_space<vmem>>, vector<256x32xbf16>
      tpu.vector_store %arg6[%c0_15, %c0_16], %18 {strides = array<i32>} : memref<256x32xbf16, #tpu.memory_space<vmem>>, vector<256x32xbf16>,
    } else {
    }
    return
  }
  func.func @transform_0(%arg0: i32, %arg1: i32, %arg2: i32) -> (i32, i32) {
    %c0_i32 = arith.constant 0 : i32
    return %arg0, %arg2 : i32, i32
  }
  func.func @transform_1(%arg0: i32, %arg1: i32, %arg2: i32) -> (i32, i32) {
    %c0_i32 = arith.constant 0 : i32
    return %arg2, %arg1 : i32, i32
  }
  func.func @transform_2(%arg0: i32, %arg1: i32, %arg2: i32) -> (i32, i32) {
    %c0_i32 = arith.constant 0 : i32
    %c0_i32_0 = arith.constant 0 : i32
    return %c0_i32, %arg1 : i32, i32
  }
  func.func @transform_3(%arg0: i32, %arg1: i32, %arg2: i32) -> (i32, i32) {
    %c0_i32 = arith.constant 0 : i32
    return %arg0, %arg1 : i32, i32
  }
}

</mosaic_0001>

<bundles_post_ra>
// kernel: tpu_custom_call.1
= control target key start
LH: loop header
LB: loop body
LE: loop exit
PB: predicated region body
PF: predicated region fallthrough
CT: control target
= control target key end

     0   :  { %8 = vsyncpa [#allocation4], 0  ;;  %s2400_s0 = inlined_call_operand.hbm [shape: bf16[2738,128], index: 0, kind: input, shape index: {}]   ;;  %s2401_s1 = inlined_call_operand.vmem [shape: bf16[128,32], index: 1, kind: input, shape index: {}]   ;;  %s2402_s2 = inlined_call_operand.vmem [shape: f32[1,32], index: 2, kind: input, shape index: {}]   ;;  %s2403_s3 = inlined_call_operand.vmem [shape: bf16[2738,32], index: 3, kind: output, shape index: {}]  }
   0x1   :  { %10 = vsyncpa [#allocation4 + $0x1], 0  ;;  %s1944_s12 = smov 0   ;;  %s1946_s13 = smov 0  }
   0x2   :  { %s1948_s14 = smov 0   ;;  %s1950_s15 = smov 0  }
   0x3   :  { %s1952_s16 = smov 0   ;;  %s1954_s17 = smov 0  }
   0x4 LB: > { %s1422_s18 = sadd.s32 4294967295, %s1886_s17   ;;  %s35_s19 = sadd.s32 1, %s1882_s16  ;;  %s1886_s17 = sphi %s1954_s17, %s16_s17   ;;  %s1882_s16 = sphi %s1952_s16, %s2413_s16   ;;  %s1878_s15 = sphi %s1950_s15, %s2412_s15   ;;  %s1874_s14 = sphi %s1948_s14, %s2411_s14   ;;  %s1870_s13 = sphi %s1946_s13, %s2410_s13   ;;  %s1866_s12 = sphi %s1944_s12, %s2409_s12  }
   0x5   : > { %p37_p0 = scmp.ge.s32.totalorder %s35_s19, 11  ;;  %s44_s20 = sadd.s32 1, %s1874_s14 }
   0x6   : > { %p51_p1 = scmp.ne.s32.totalorder %s1874_s14, %s1870_s13  ;;  %p52_p2 = scmp.eq.s32.totalorder %s1886_s17, 0 }
   0x7   : > { %s2415_s19 = smov (%p37_p0, %s35_s19), 0  ;;  %p57_p4 = scmp.ne.s32.totalorder %s1870_s13, %s1866_s12 }
   0x8   : > { %p53_p3 = por %p52_p2, %p51_p1  ;;  %s39_s21 = ssub.s32 %s1882_s16, %s2415_s19 }
   0x9   : > { %p58_p5 = scmp.eq.s32.totalorder %s1422_s18, 0  ;;  %p42_p6 = scmp.eq.s32.totalorder %s39_s21, 0 }
   0xa   : > { %p137_p7 = scmp.eq.s32.totalorder %s1422_s18, 10  ;;  %p1427_p10 = scmp.ge.s32.totalorder %s1886_s17, 11 }
   0xb   : > { %p1983_p8 = por %p58_p5, %p57_p4 }
   0xc   : > { %s1988_s23 = scalar_select %p42_p6, %s1874_s14, %s44_s20  }
   0xd   : > { %p1990_p9 = por %p137_p7, %p51_p1  ;;  %177 = sbr.rel (%p1427_p10) target bundleno = 55 (0x37), region = 24 }
  0x14   : > { %180 = sbr.rel (!%p53_p3) target bundleno = 55 (0x37), region = 28  ;;  %s181_s25 = sand.u32 (%p53_p3), 1, %s1874_s14  }
  0x15   : > { %s1429_s26 = sshll.u32 (%p53_p3), %s1882_s16, 5  ;;  %s1428_s27 = sshll.u32 (%p53_p3), %s181_s25, 7 }
  0x16   : > { %s187_s28 = ssub.s32 (%p53_p3), 343, %s1429_s26  ;;  %s2000_s4 = scalar_lea.sflag (%p53_p3), [#allocation4], %s181_s25 }
  0x17   : > { %p188_p11 = scmp.lt.s32.totalorder (%p53_p3), %s187_s28, 32  ;;  %s185_s5 = scalar_lea.vmem (%p53_p3), [#allocation3], %s1428_s27 }
  0x1b   : > { %s2417_s28 = smov (!%p188_p11, %s187_s28), 32 }
  0x1c   : > { %s1997_s29 = sshll.u32 %s2417_s28, 6 }
  0x1d   : > { %s192_s30 = ssub.s32 2048, %s1997_s29 }
  0x1e   : > { %193 = vsyncadd %s2000_s4, %s192_s30  ;;  %p1431_p12 = scmp.ne.s32.totalorder %s1997_s29, 0  ;;  %s1512_s6 = sshll.u32 %s1882_s16, 11 }
  0x1f   : > { %s2008_s9 = scalar_lea.hbm %s2400_s0, %s1512_s6  ;;  %s199_s10 = sshll.u32 %s185_s5, 4  ;;  %s2010_s10 = int_to_ptr.vmem [resolvable:$true] %s199_s10 }
  0x20   : > { %s1776_s11 = scalar_lea.hbm %s2008_s9, %s1997_s29  ;;  %s1780_s20 = scalar_lea.hbm %s2400_s0, 21952 }
  0x21   : > { %p1777_p13 = scmp.ne.s32.totalorder %s2008_s9, %s1776_s11  ;;  %p1781_p2 = scmp.lt.u32.totalorder %s2008_s9, %s2400_s0 }
  0x22   : > { %p1782_p3 = scmp.lt.u32.totalorder %s1780_s20, %s1776_s11  ;;  %p1784_p5 = scmp.lt.u32.totalorder %s1776_s11, %s2008_s9 }
  0x23   : > { %p1778_p0 = pnand %p1777_p13, %p1431_p12 }
  0x24   : > { %p1783_p4 = por %p1782_p3, %p1781_p2 }
  0x25   : > { %p1779_p1 = pneg %p1778_p0 }
  0x26   : > { %p1785_p6 = por %p1784_p5, %p1783_p4 }
  0x28   : > { %p1786_p7 = pnand %p1785_p6, %p1779_p1 }
  0x2a   : > { %1789 = shalt.err (!%p1786_p7)
}
  0x2b   : > { %s1790_s26 = scalar_lea.vmem %s2010_s10, %s1997_s29  ;;  %s1920_s27 = smov [#allocation3]  }
  0x2c   : > { %p1791_p10 = scmp.ne.s32.totalorder %s2010_s10, %s1790_s26  ;;  %s1794_s28 = sshll.u32 %s1920_s27, 4  ;;  %s1795_s28 = int_to_ptr.vmem [resolvable:$false] %s1794_s28 }
  0x2d   : > { %s1796_s30 = scalar_lea.vmem %s1795_s28, 4096  ;;  %p1797_p0 = scmp.lt.s32.totalorder %s2010_s10, %s1795_s28 }
  0x2e   : > { %p1792_p11 = pnand %p1791_p10, %p1431_p12  ;;  %p1798_p2 = scmp.lt.s32.totalorder %s1796_s30, %s1790_s26 }
  0x30   : > { %p1793_p13 = pneg %p1792_p11  ;;  %p1799_p3 = por %p1798_p2, %p1797_p0 }
  0x32   : > { %p1800_p4 = pnand %p1799_p3, %p1793_p13 }
  0x34   : > { %1803 = shalt.err (!%p1800_p4)
}
  0x35   : > { %s1921_s5 = smov 64   ;;  %s1922_s6 = smov 4  }
  0x36   : > { %205 = dma.hbm_to_vmem [thread:$0]  (%p1431_p12), %s2008_s9, %s1997_s29, %s2010_s10, %s2000_s4, %s1921_s5, %s1921_s5, %s1922_s6  }
  0x37 PF: > { %p1435_p1 = scmp.ge.s32.totalorder %s1886_s17, 1  ;;  %p207_p5 = scmp.lt.s32.totalorder %s1886_s17, 12 }
  0x39   : > { %p208_p6 = pnand %p1435_p1, %p207_p5 }
  0x3a   : > { %s213_s7 = sand.u32 (!%p208_p6), 1, %s1870_s13  }
  0x3b   : > { %211 = sbr.rel (%p208_p6) target bundleno = 431 (0x1af), region = 32  ;;  %s2040_s8 = sshll.u32 (!%p208_p6), %s213_s7, 7 }
  0x3c   : > { %s214_s11 = scalar_lea.sflag (!%p208_p6), [#allocation4], %s213_s7  ;;  %s2043_s12 = scalar_lea.vmem (!%p208_p6), [#allocation3], %s2040_s8 }
  0x42   : > { %1861 = dma.done.wait (%p1983_p8), %s214_s11, 2048  }
  0x43   : > { %1863 = vsyncadd (%p1983_p8), %s214_s11, 4294965248  ;;  %vm277_vm0 = vcmask 261120   ;;  %v1923_v0 = vmov 0.0   ;;  %v1752_v1 = vld [vmem:[%s2401_s1] sm:$0xff]   ;;  %v1753_v2 = vld [vmem:[%s2401_s1 + $0x8] sm:$0xff]   ;;  %vm994_vm1 = vcmask 257024  }
  0x44   : > { %280 = vst.msk [vmem:[#allocation2 + $0x10] sm:$0xff] %vm277_vm0, %v1923_v0  ;;  %278 = vst.msk [vmem:[#allocation2] sm:$0xff] %vm277_vm0, %v1923_v0  ;;  %1572 = vmatprep.subr.bf16.mxu0 %v1752_v1  ;;  %1620 = vmatprep.subr.bf16.mxu1 %v1752_v1  ;;  %v1754_v3 = vld [vmem:[%s2401_s1 + $0x10] sm:$0xff]   ;;  %v1755_v4 = vld [vmem:[%s2401_s1 + $0x18] sm:$0xff]   ;;  %s2151_s22 = scalar_lea.vmem [#allocation5], %s2040_s8   ;;  %s1496_s8 = sshll.u32 (%p1990_p9), %s1878_s15, 5 }
  0x45   : > { %279 = vst.msk [vmem:[#allocation2 + $0x8] sm:$0xff] %vm277_vm0, %v1923_v0  ;;  %281 = vst.msk [vmem:[#allocation2 + $0x18] sm:$0xff] %vm277_vm0, %v1923_v0  ;;  %1573 = vmatpush3.bf16.msra.mxu0 %v1752_v1  ;;  %1628 = vmatpush3.bf16.msra.mxu1 %v1752_v1  ;;  %v1760_v5 = vld [vmem:[%s2043_s12] sm:$0xff]   ;;  %v1757_v8 = vld [vmem:[%s2401_s1 + $0x28] sm:$0xff]   ;;  %s1545_s29 = sshll.u32 (%p1990_p9), %s1878_s15, 7  ;;  %s1035_s4 = ssub.s32 (%p1990_p9), 343, %s1496_s8 }
  0x46   : > { %282 = vst.msk [vmem:[#allocation2 + $0x20] sm:$0xff] %vm277_vm0, %v1923_v0  ;;  %283 = vst.msk [vmem:[#allocation2 + $0x28] sm:$0xff] %vm277_vm0, %v1923_v0  ;;  %1574 = vmatprep.subr.bf16.mxu0 %v1753_v2  ;;  %1621 = vmatprep.subr.bf16.mxu1 %v1753_v2  ;;  %v1761_v6 = vld [vmem:[%s2043_s12 + $0x40] sm:$0xff]   ;;  %v1758_v9 = vld [vmem:[%s2401_s1 + $0x30] sm:$0xff]   ;;  %s2264_s18 = scalar_lea.vmem (%p1990_p9), %s2403_s3, %s1545_s29   ;;  %p1036_p8 = scmp.lt.s32.totalorder (%p1990_p9), %s1035_s4, 32 }
  0x47   : > { %284 = vst.msk [vmem:[#allocation2 + $0x30] sm:$0xff] %vm277_vm0, %v1923_v0  ;;  %285 = vst.msk [vmem:[#allocation2 + $0x38] sm:$0xff] %vm277_vm0, %v1923_v0  ;;  %1588 = vmatprep.mubr.bf16.mxu0 %v1760_v5  ;;  %v1756_v7 = vld [vmem:[%s2401_s1 + $0x20] sm:$0xff]   ;;  %1604 = vmatprep.mubr.bf16.mxu1 %v1761_v6  ;;  %v1759_v10 = vld [vmem:[%s2401_s1 + $0x38] sm:$0xff]  }
  0x48   : > { %286 = vst.msk [vmem:[#allocation2 + $0x40] sm:$0xff] %vm277_vm0, %v1923_v0  ;;  %287 = vst.msk [vmem:[#allocation2 + $0x48] sm:$0xff] %vm277_vm0, %v1923_v0  ;;  %v1762_v11 = vld [vmem:[%s2043_s12 + $0x8] sm:$0xff]   ;;  %v1764_v13 = vld [vmem:[%s2043_s12 + $0x10] sm:$0xff]  }
  0x49   : > { %288 = vst.msk [vmem:[#allocation2 + $0x50] sm:$0xff] %vm277_vm0, %v1923_v0  ;;  %289 = vst.msk [vmem:[#allocation2 + $0x58] sm:$0xff] %vm277_vm0, %v1923_v0  ;;  %1575 = vmatpush3.bf16.msra.mxu0 %v1753_v2  ;;  %1629 = vmatpush3.bf16.msra.mxu1 %v1753_v2  ;;  %v1763_v12 = vld [vmem:[%s2043_s12 + $0x48] sm:$0xff]   ;;  %v1765_v14 = vld [vmem:[%s2043_s12 + $0x50] sm:$0xff]  }
  0x4a   : > { %290 = vst.msk [vmem:[#allocation2 + $0x60] sm:$0xff] %vm277_vm0, %v1923_v0  ;;  %291 = vst.msk [vmem:[#allocation2 + $0x68] sm:$0xff] %vm277_vm0, %v1923_v0  ;;  %1576 = vmatprep.subr.bf16.mxu0 %v1754_v3  ;;  %1622 = vmatprep.subr.bf16.mxu1 %v1754_v3  ;;  %v1766_v15 = vld [vmem:[%s2043_s12 + $0x18] sm:$0xff]   ;;  %v1768_v17 = vld [vmem:[%s2043_s12 + $0x20] sm:$0xff]  }
  0x4b   : > { %292 = vst.msk [vmem:[#allocation2 + $0x70] sm:$0xff] %vm277_vm0, %v1923_v0  ;;  %293 = vst.msk [vmem:[#allocation2 + $0x78] sm:$0xff] %vm277_vm0, %v1923_v0  ;;  %v1767_v16 = vld [vmem:[%s2043_s12 + $0x58] sm:$0xff]   ;;  %v1769_v18 = vld [vmem:[%s2043_s12 + $0x60] sm:$0xff]  }
  0x4c   : > { %294 = vst.msk [vmem:[#allocation2 + $0x80] sm:$0xff] %vm277_vm0, %v1923_v0  ;;  %295 = vst.msk [vmem:[#allocation2 + $0x88] sm:$0xff] %vm277_vm0, %v1923_v0  ;;  %v1770_v19 = vld [vmem:[%s2043_s12 + $0x28] sm:$0xff]   ;;  %v1772_v21 = vld [vmem:[%s2043_s12 + $0x30] sm:$0xff]  }
  0x4d   : > { %296 = vst.msk [vmem:[#allocation2 + $0x90] sm:$0xff] %vm277_vm0, %v1923_v0  ;;  %297 = vst.msk [vmem:[#allocation2 + $0x98] sm:$0xff] %vm277_vm0, %v1923_v0  ;;  %1577 = vmatpush3.bf16.msra.mxu0 %v1754_v3  ;;  %1630 = vmatpush3.bf16.msra.mxu1 %v1754_v3  ;;  %v1771_v20 = vld [vmem:[%s2043_s12 + $0x68] sm:$0xff]   ;;  %v1773_v22 = vld [vmem:[%s2043_s12 + $0x70] sm:$0xff]  }
  0x4e   : > { %298 = vst.msk [vmem:[#allocation2 + $0xa0] sm:$0xff] %vm277_vm0, %v1923_v0  ;;  %299 = vst.msk [vmem:[#allocation2 + $0xa8] sm:$0xff] %vm277_vm0, %v1923_v0  ;;  %1578 = vmatprep.subr.bf16.mxu0 %v1755_v4  ;;  %1623 = vmatprep.subr.bf16.mxu1 %v1755_v4  ;;  %v1774_v23 = vld [vmem:[%s2043_s12 + $0x38] sm:$0xff]   ;;  %v312_v25 = vld [vmem:[#allocation2 + $0x10] sm:$0xff] }
  0x4f   : > { %300 = vst.msk [vmem:[#allocation2 + $0xb0] sm:$0xff] %vm277_vm0, %v1923_v0  ;;  %301 = vst.msk [vmem:[#allocation2 + $0xb8] sm:$0xff] %vm277_vm0, %v1923_v0  ;;  %v1775_v24 = vld [vmem:[%s2043_s12 + $0x78] sm:$0xff]   ;;  %v310_v27 = vld [vmem:[#allocation2] sm:$0xff] }
  0x50   : > { %302 = vst.msk [vmem:[#allocation2 + $0xc0] sm:$0xff] %vm277_vm0, %v1923_v0  ;;  %303 = vst.msk [vmem:[#allocation2 + $0xc8] sm:$0xff] %vm277_vm0, %v1923_v0  ;;  %v313_v31 = vld [vmem:[#allocation2 + $0x18] sm:$0xff]  ;;  %v311_v37 = vld [vmem:[#allocation2 + $0x8] sm:$0xff] }
  0x51   : > { %304 = vst.msk [vmem:[#allocation2 + $0xd0] sm:$0xff] %vm277_vm0, %v1923_v0  ;;  %305 = vst.msk [vmem:[#allocation2 + $0xd8] sm:$0xff] %vm277_vm0, %v1923_v0  ;;  %1579 = vmatpush3.bf16.msra.mxu0 %v1755_v4  ;;  %1631 = vmatpush3.bf16.msra.mxu1 %v1755_v4  ;;  %v316_v49 = vld [vmem:[#allocation2 + $0x30] sm:$0xff]  ;;  %v314_v51 = vld [vmem:[#allocation2 + $0x20] sm:$0xff] }
  0x52   : > { %306 = vst.msk [vmem:[#allocation2 + $0xe0] sm:$0xff] %vm277_vm0, %v1923_v0  ;;  %307 = vst.msk [vmem:[#allocation2 + $0xe8] sm:$0xff] %vm277_vm0, %v1923_v0  ;;  %1580 = vmatprep.subr.bf16.mxu0 %v1756_v7  ;;  %1624 = vmatprep.subr.bf16.mxu1 %v1756_v7  ;;  %v2132_v53 = vld [vmem:[%s2402_s2] ss:$0 sm:$0xff]  ;;  %v317_v56 = vld [vmem:[#allocation2 + $0x38] sm:$0xff] }
  0x53   : > { %308 = vst.msk [vmem:[#allocation2 + $0xf0] sm:$0xff] %vm277_vm0, %v1923_v0  ;;  %309 = vst.msk [vmem:[#allocation2 + $0xf8] sm:$0xff] %vm277_vm0, %v1923_v0  ;;  %v326_v28 = vld [vmem:[#allocation2 + $0x80] sm:$0xff]  ;;  %v327_v38 = vld [vmem:[#allocation2 + $0x88] sm:$0xff] }
  0x54   : > { %v328_v26 = vld [vmem:[#allocation2 + $0x90] sm:$0xff]  ;;  %v329_v32 = vld [vmem:[#allocation2 + $0x98] sm:$0xff]  ;;  %v315_v62 = vld [vmem:[#allocation2 + $0x28] sm:$0xff] }
  0x55   : > { %1581 = vmatpush3.bf16.msra.mxu0 %v1756_v7  ;;  %1632 = vmatpush3.bf16.msra.mxu1 %v1756_v7  ;;  %v330_v52 = vld [vmem:[#allocation2 + $0xa0] sm:$0xff]  ;;  %v331_v63 = vld [vmem:[#allocation2 + $0xa8] sm:$0xff] }
  0x56   : > { %1582 = vmatprep.subr.bf16.mxu0 %v1757_v8  ;;  %1625 = vmatprep.subr.bf16.mxu1 %v1757_v8  ;;  %v332_v50 = vld [vmem:[#allocation2 + $0xb0] sm:$0xff]  ;;  %v333_v57 = vld [vmem:[#allocation2 + $0xb8] sm:$0xff] }
  0x59   : > { %1583 = vmatpush3.bf16.msra.mxu0 %v1757_v8  ;;  %1633 = vmatpush3.bf16.msra.mxu1 %v1757_v8 }
  0x5a   : > { %1584 = vmatprep.subr.bf16.mxu0 %v1758_v9  ;;  %1626 = vmatprep.subr.bf16.mxu1 %v1758_v9 }
  0x5d   : > { %1585 = vmatpush3.bf16.msra.mxu0 %v1758_v9  ;;  %1634 = vmatpush3.bf16.msra.mxu1 %v1758_v9 }
  0x5e   : > { %1586 = vmatprep.subr.bf16.mxu0 %v1759_v10  ;;  %1627 = vmatprep.subr.bf16.mxu1 %v1759_v10 }
  0x61   : > { %1587 = vmatpush3.bf16.msra.mxu0 %v1759_v10  ;;  %1635 = vmatpush3.bf16.msra.mxu1 %v1759_v10 }
  0x64   : > { %1589 = vmatmul.mubr.bf16.vlgmr.msra.gmra.mrb[0].mxu0 %v1762_v11  ;;  %1605 = vmatmul.mubr.bf16.vlgmr.msra.gmra.mrb[0].mxu1 %v1763_v12 }
  0x65   : > { %1592 = vmatprep.mubr.bf16.mxu0 %v1764_v13  ;;  %1608 = vmatprep.mubr.bf16.mxu1 %v1765_v14 }
  0x6c   : > { %1593 = vmatmul.mubr.bf16.gmra.mrb[4].mxu0 %v1766_v15  ;;  %1609 = vmatmul.mubr.bf16.gmra.mrb[4].mxu1 %v1767_v16 }
  0x6d   : > { %1596 = vmatprep.mubr.bf16.mxu0 %v1768_v17  ;;  %1612 = vmatprep.mubr.bf16.mxu1 %v1769_v18 }
  0x74   : > { %1597 = vmatmul.mubr.bf16.gmra.mrb[8].mxu0 %v1770_v19  ;;  %1613 = vmatmul.mubr.bf16.gmra.mrb[8].mxu1 %v1771_v20 }
  0x75   : > { %1600 = vmatprep.mubr.bf16.mxu0 %v1772_v21  ;;  %1616 = vmatprep.mubr.bf16.mxu1 %v1773_v22 }
  0x7c   : > { %1601 = vmatmul.mubr.bf16.gmra.mrb[12].mxu0 %v1774_v23  ;;  %1617 = vmatmul.mubr.bf16.gmra.mrb[12].mxu1 %v1775_v24 }
 0x137   : > { %v1590_v29 = vpop.f32.mrb[0].mxu0  ;;  %v1606_v30 = vpop.f32.mrb[0].mxu1 }
 0x138   : > { %v697_v33 = vadd.f32 %v1590_v29, %v312_v25  ;;  %v713_v34 = vadd.f32 %v1606_v30, %v328_v26  ;;  %v568_v35 = vpop.f32.mrb[1].mxu0  ;;  %v632_v36 = vpop.f32.mrb[1].mxu1  ;;  %v320_v30 = vld [vmem:[#allocation2 + $0x50] sm:$0xff] }
 0x139   : > { %v695_v39 = vadd.f32 %v568_v35, %v310_v27  ;;  %v711_v40 = vadd.f32 %v632_v36, %v326_v28  ;;  %v1591_v41 = vpop.f32.mrb[2].mxu0  ;;  %v1607_v42 = vpop.f32.mrb[2].mxu1  ;;  %v318_v36 = vld [vmem:[#allocation2 + $0x40] sm:$0xff] }
 0x13a   : > { %730 = vst.msk [vmem:[#allocation2 + $0x10] sm:$0xff] %vm277_vm0, %v697_v33  ;;  %746 = vst.msk [vmem:[#allocation2 + $0x90] sm:$0xff] %vm277_vm0, %v713_v34  ;;  %v698_v43 = vadd.f32 %v1591_v41, %v313_v31  ;;  %v714_v44 = vadd.f32 %v1607_v42, %v329_v32  ;;  %v571_v45 = vpop.f32.mrb[3].mxu0  ;;  %v635_v46 = vpop.f32.mrb[3].mxu1  ;;  %v336_v31 = vld [vmem:[#allocation2 + $0xd0] sm:$0xff] }
 0x13b   : > { %728 = vst.msk [vmem:[#allocation2] sm:$0xff] %vm277_vm0, %v695_v39  ;;  %744 = vst.msk [vmem:[#allocation2 + $0x80] sm:$0xff] %vm277_vm0, %v711_v40  ;;  %v696_v47 = vadd.f32 %v571_v45, %v311_v37  ;;  %v712_v48 = vadd.f32 %v635_v46, %v327_v38  ;;  %v334_v37 = vld [vmem:[#allocation2 + $0xc0] sm:$0xff]  ;;  %v337_v45 = vld [vmem:[#allocation2 + $0xd8] sm:$0xff] }
 0x13c   : > { %731 = vst.msk [vmem:[#allocation2 + $0x18] sm:$0xff] %vm277_vm0, %v698_v43  ;;  %747 = vst.msk [vmem:[#allocation2 + $0x98] sm:$0xff] %vm277_vm0, %v714_v44  ;;  %v321_v44 = vld [vmem:[#allocation2 + $0x58] sm:$0xff] }
 0x13d   : > { %729 = vst.msk [vmem:[#allocation2 + $0x8] sm:$0xff] %vm277_vm0, %v696_v47  ;;  %745 = vst.msk [vmem:[#allocation2 + $0x88] sm:$0xff] %vm277_vm0, %v712_v48 }
 0x13f   : > { %v1594_v54 = vpop.f32.mrb[4].mxu0  ;;  %v1610_v55 = vpop.f32.mrb[4].mxu1 }
 0x140   : > { %v701_v58 = vadd.f32 %v1594_v54, %v316_v49  ;;  %v717_v59 = vadd.f32 %v1610_v55, %v332_v50  ;;  %v584_v60 = vpop.f32.mrb[5].mxu0  ;;  %v648_v61 = vpop.f32.mrb[5].mxu1  ;;  %v335_v54 = vld [vmem:[#allocation2 + $0xc8] sm:$0xff] }
 0x141   : > { %v765_v0 = vld [vmem:[#allocation2 + $0x10] sm:$0xff]  ;;  %v699_v2 = vadd.f32 %v584_v60, %v314_v51  ;;  %v715_v3 = vadd.f32 %v648_v61, %v330_v52  ;;  %v1595_v4 = vpop.f32.mrb[6].mxu0  ;;  %v1611_v5 = vpop.f32.mrb[6].mxu1  ;;  %v319_v52 = vld [vmem:[#allocation2 + $0x48] sm:$0xff] }
 0x142   : > { %v781_v1 = vld [vmem:[#allocation2 + $0x90] sm:$0xff]  ;;  %v804_v6 = vadd.f32 %v2132_v53, %v765_v0  ;;  %v763_v8 = vld [vmem:[#allocation2] sm:$0xff]  ;;  %734 = vst.msk [vmem:[#allocation2 + $0x30] sm:$0xff] %vm277_vm0, %v701_v58  ;;  %750 = vst.msk [vmem:[#allocation2 + $0xb0] sm:$0xff] %vm277_vm0, %v717_v59  ;;  %v702_v10 = vadd.f32 %v1595_v4, %v317_v56  ;;  %v718_v11 = vadd.f32 %v1611_v5, %v333_v57  ;;  %v587_v12 = vpop.f32.mrb[7].mxu0  ;;  %v651_v13 = vpop.f32.mrb[7].mxu1 }
 0x143   : > { %v820_v7 = vadd.f32 %v2132_v53, %v781_v1  ;;  %v779_v9 = vld [vmem:[#allocation2 + $0x80] sm:$0xff]  ;;  %v802_v14 = vadd.f32 %v2132_v53, %v763_v8  ;;  %v766_v16 = vld [vmem:[#allocation2 + $0x18] sm:$0xff]  ;;  %732 = vst.msk [vmem:[#allocation2 + $0x20] sm:$0xff] %vm277_vm0, %v699_v2  ;;  %748 = vst.msk [vmem:[#allocation2 + $0xa0] sm:$0xff] %vm277_vm0, %v715_v3  ;;  %v700_v18 = vadd.f32 %v587_v12, %v315_v62 }
 0x144   : > { %v818_v15 = vadd.f32 %v2132_v53, %v779_v9  ;;  %v782_v17 = vld [vmem:[#allocation2 + $0x98] sm:$0xff]  ;;  %v716_v19 = vadd.f32 %v651_v13, %v331_v63  ;;  %v836_v20 = vmax.f32 %v804_v6, 0.0  ;;  %v805_v22 = vadd.f32 %v2132_v53, %v766_v16  ;;  %v764_v24 = vld [vmem:[#allocation2 + $0x8] sm:$0xff]  ;;  %735 = vst.msk [vmem:[#allocation2 + $0x38] sm:$0xff] %vm277_vm0, %v702_v10  ;;  %751 = vst.msk [vmem:[#allocation2 + $0xb8] sm:$0xff] %vm277_vm0, %v718_v11 }
 0x145   : > { %v852_v21 = vmax.f32 %v820_v7, 0.0  ;;  %v821_v23 = vadd.f32 %v2132_v53, %v782_v17  ;;  %v780_v25 = vld [vmem:[#allocation2 + $0x88] sm:$0xff]  ;;  %v834_v26 = vmax.f32 %v802_v14, 0.0  ;;  %v803_v28 = vadd.f32 %v2132_v53, %v764_v24  ;;  %733 = vst.msk [vmem:[#allocation2 + $0x28] sm:$0xff] %vm277_vm0, %v700_v18  ;;  %v340_v24 = vld [vmem:[#allocation2 + $0xf0] sm:$0xff] }
 0x146   : > { %v850_v27 = vmax.f32 %v818_v15, 0.0  ;;  %v819_v29 = vadd.f32 %v2132_v53, %v780_v25  ;;  %749 = vst.msk [vmem:[#allocation2 + $0xa8] sm:$0xff] %vm277_vm0, %v716_v19  ;;  %v1515_v32 = vpack.c.bf16 %v836_v20, %v836_v20  ;;  %v837_v34 = vmax.f32 %v805_v22, 0.0 }
 0x147   : > { %v1531_v33 = vpack.c.bf16 %v852_v21, %v852_v21  ;;  %v853_v35 = vmax.f32 %v821_v23, 0.0  ;;  %v1513_v38 = vpack.c.bf16 %v834_v26, %v834_v26  ;;  %v835_v40 = vmax.f32 %v803_v28, 0.0  ;;  %v1598_v42 = vpop.f32.mrb[8].mxu0  ;;  %v1614_v43 = vpop.f32.mrb[8].mxu1  ;;  %v324_v23 = vld [vmem:[#allocation2 + $0x70] sm:$0xff] }
 0x148   : > { %v1529_v39 = vpack.c.bf16 %v850_v27, %v850_v27  ;;  %v851_v41 = vmax.f32 %v819_v29, 0.0  ;;  %997 = vst.msk [vmem:[%s2151_s22 + $0x8] sm:$0xf] %vm994_vm1, %v1515_v32  ;;  %v1516_v46 = vpack.c.bf16 %v837_v34, %v837_v34  ;;  %v705_v48 = vadd.f32 %v1598_v42, %v320_v30  ;;  %v600_v50 = vpop.f32.mrb[9].mxu0  ;;  %v664_v51 = vpop.f32.mrb[9].mxu1  ;;  %v322_v29 = vld [vmem:[#allocation2 + $0x60] sm:$0xff] }
 0x149   : > { %1013 = vst.msk [vmem:[%s2151_s22 + $0x48] sm:$0xf] %vm994_vm1, %v1531_v33  ;;  %v1532_v47 = vpack.c.bf16 %v853_v35, %v853_v35  ;;  %v721_v49 = vadd.f32 %v1614_v43, %v336_v31  ;;  %995 = vst.msk [vmem:[%s2151_s22] sm:$0xf] %vm994_vm1, %v1513_v38  ;;  %v1514_v55 = vpack.c.bf16 %v835_v40, %v835_v40  ;;  %v769_v57 = vld [vmem:[#allocation2 + $0x30] sm:$0xff]  ;;  %v1599_v61 = vpop.f32.mrb[10].mxu0 }
 0x14a   : > { %1011 = vst.msk [vmem:[%s2151_s22 + $0x40] sm:$0xf] %vm994_vm1, %v1529_v39  ;;  %v1530_v56 = vpack.c.bf16 %v851_v41, %v851_v41  ;;  %v785_v58 = vld [vmem:[#allocation2 + $0xb0] sm:$0xff]  ;;  %v703_v59 = vadd.f32 %v600_v50, %v318_v36  ;;  %v719_v60 = vadd.f32 %v664_v51, %v334_v37  ;;  %v1615_v62 = vpop.f32.mrb[10].mxu1  ;;  %998 = vst.msk [vmem:[%s2151_s22 + $0xc] sm:$0xf] %vm994_vm1, %v1516_v46 }
 0x14b   : > { %1014 = vst.msk [vmem:[%s2151_s22 + $0x4c] sm:$0xf] %vm994_vm1, %v1532_v47  ;;  %v808_v63 = vadd.f32 %v2132_v53, %v769_v57  ;;  %v824_v0 = vadd.f32 %v2132_v53, %v785_v58  ;;  %v767_v1 = vld [vmem:[#allocation2 + $0x20] sm:$0xff]  ;;  %v706_v3 = vadd.f32 %v1599_v61, %v321_v44  ;;  %v722_v4 = vadd.f32 %v1615_v62, %v337_v45  ;;  %v603_v5 = vpop.f32.mrb[11].mxu0  ;;  %v667_v6 = vpop.f32.mrb[11].mxu1  ;;  %v770_v9 = vld [vmem:[#allocation2 + $0x38] sm:$0xff] }
 0x14c   : > { %v783_v2 = vld [vmem:[#allocation2 + $0xa0] sm:$0xff]  ;;  %738 = vst.msk [vmem:[#allocation2 + $0x50] sm:$0xff] %vm277_vm0, %v705_v48  ;;  %754 = vst.msk [vmem:[#allocation2 + $0xd0] sm:$0xff] %vm277_vm0, %v721_v49  ;;  %v806_v7 = vadd.f32 %v2132_v53, %v767_v1  ;;  %v786_v10 = vld [vmem:[#allocation2 + $0xb8] sm:$0xff]  ;;  %v704_v11 = vadd.f32 %v603_v5, %v319_v52  ;;  %v720_v12 = vadd.f32 %v667_v6, %v335_v54 }
 0x14d   : > { %996 = vst.msk [vmem:[%s2151_s22 + $0x4] sm:$0xf] %vm994_vm1, %v1514_v55  ;;  %1012 = vst.msk [vmem:[%s2151_s22 + $0x44] sm:$0xf] %vm994_vm1, %v1530_v56  ;;  %v822_v8 = vadd.f32 %v2132_v53, %v783_v2  ;;  %v840_v13 = vmax.f32 %v808_v63, 0.0  ;;  %v856_v14 = vmax.f32 %v824_v0, 0.0  ;;  %v809_v15 = vadd.f32 %v2132_v53, %v770_v9 }
 0x14e   : > { %736 = vst.msk [vmem:[#allocation2 + $0x40] sm:$0xff] %vm277_vm0, %v703_v59  ;;  %752 = vst.msk [vmem:[#allocation2 + $0xc0] sm:$0xff] %vm277_vm0, %v719_v60  ;;  %v825_v16 = vadd.f32 %v2132_v53, %v786_v10  ;;  %v768_v17 = vld [vmem:[#allocation2 + $0x28] sm:$0xff]  ;;  %v838_v19 = vmax.f32 %v806_v7, 0.0  ;;  %v338_v30 = vld [vmem:[#allocation2 + $0xe0] sm:$0xff] }
 0x14f   : > { %v784_v18 = vld [vmem:[#allocation2 + $0xa8] sm:$0xff]  ;;  %739 = vst.msk [vmem:[#allocation2 + $0x58] sm:$0xff] %vm277_vm0, %v706_v3  ;;  %755 = vst.msk [vmem:[#allocation2 + $0xd8] sm:$0xff] %vm277_vm0, %v722_v4  ;;  %v854_v20 = vmax.f32 %v822_v8, 0.0  ;;  %v807_v21 = vadd.f32 %v2132_v53, %v768_v17  ;;  %v1519_v25 = vpack.c.bf16 %v840_v13, %v840_v13  ;;  %v1535_v26 = vpack.c.bf16 %v856_v14, %v856_v14  ;;  %v1602_v35 = vpop.f32.mrb[12].mxu0  ;;  %v1618_v36 = vpop.f32.mrb[12].mxu1 }
 0x150   : > { %v823_v22 = vadd.f32 %v2132_v53, %v784_v18  ;;  %737 = vst.msk [vmem:[#allocation2 + $0x48] sm:$0xff] %vm277_vm0, %v704_v11  ;;  %753 = vst.msk [vmem:[#allocation2 + $0xc8] sm:$0xff] %vm277_vm0, %v720_v12  ;;  %v841_v27 = vmax.f32 %v809_v15, 0.0  ;;  %v857_v28 = vmax.f32 %v825_v16, 0.0  ;;  %v1517_v31 = vpack.c.bf16 %v838_v19, %v838_v19  ;;  %v325_v37 = vld [vmem:[#allocation2 + $0x78] sm:$0xff]  ;;  %v616_v43 = vpop.f32.mrb[13].mxu0 }
 0x151   : > { %v1533_v32 = vpack.c.bf16 %v854_v20, %v854_v20  ;;  %v839_v33 = vmax.f32 %v807_v21, 0.0  ;;  %v341_v38 = vld [vmem:[#allocation2 + $0xf8] sm:$0xff]  ;;  %1001 = vst.msk [vmem:[%s2151_s22 + $0x18] sm:$0xf] %vm994_vm1, %v1519_v25  ;;  %1017 = vst.msk [vmem:[%s2151_s22 + $0x58] sm:$0xf] %vm994_vm1, %v1535_v26  ;;  %v709_v41 = vadd.f32 %v1602_v35, %v324_v23  ;;  %v725_v42 = vadd.f32 %v1618_v36, %v340_v24 }
 0x152   : > { %v855_v34 = vmax.f32 %v823_v22, 0.0  ;;  %v1520_v39 = vpack.c.bf16 %v841_v27, %v841_v27  ;;  %v1536_v40 = vpack.c.bf16 %v857_v28, %v857_v28  ;;  %v680_v44 = vpop.f32.mrb[13].mxu1  ;;  %v323_v45 = vld [vmem:[#allocation2 + $0x68] sm:$0xff]  ;;  %999 = vst.msk [vmem:[%s2151_s22 + $0x10] sm:$0xf] %vm994_vm1, %v1517_v31  ;;  %v707_v51 = vadd.f32 %v616_v43, %v322_v29  ;;  %v1603_v54 = vpop.f32.mrb[14].mxu0 }
 0x153   : > { %v339_v46 = vld [vmem:[#allocation2 + $0xe8] sm:$0xff]  ;;  %1015 = vst.msk [vmem:[%s2151_s22 + $0x50] sm:$0xf] %vm994_vm1, %v1533_v32  ;;  %v1518_v47 = vpack.c.bf16 %v839_v33, %v839_v33  ;;  %v773_v49 = vld [vmem:[#allocation2 + $0x50] sm:$0xff]  ;;  %v723_v52 = vadd.f32 %v680_v44, %v338_v30  ;;  %v1619_v55 = vpop.f32.mrb[14].mxu1  ;;  %v710_v60 = vadd.f32 %v1603_v54, %v325_v37  ;;  %v619_v62 = vpop.f32.mrb[15].mxu0 }
 0x154   : > { %v1534_v48 = vpack.c.bf16 %v855_v34, %v855_v34  ;;  %v789_v50 = vld [vmem:[#allocation2 + $0xd0] sm:$0xff]  ;;  %1002 = vst.msk [vmem:[%s2151_s22 + $0x1c] sm:$0xf] %vm994_vm1, %v1520_v39  ;;  %1018 = vst.msk [vmem:[%s2151_s22 + $0x5c] sm:$0xf] %vm994_vm1, %v1536_v40  ;;  %v812_v56 = vadd.f32 %v2132_v53, %v773_v49  ;;  %v726_v61 = vadd.f32 %v1619_v55, %v341_v38  ;;  %v683_v63 = vpop.f32.mrb[15].mxu1 }
 0x155   : > { %v828_v57 = vadd.f32 %v2132_v53, %v789_v50  ;;  %v771_v58 = vld [vmem:[#allocation2 + $0x40] sm:$0xff]  ;;  %742 = vst.msk [vmem:[#allocation2 + $0x70] sm:$0xff] %vm277_vm0, %v709_v41  ;;  %758 = vst.msk [vmem:[#allocation2 + $0xf0] sm:$0xff] %vm277_vm0, %v725_v42  ;;  %v708_v4 = vadd.f32 %v619_v62, %v323_v45  ;;  %v724_v5 = vadd.f32 %v683_v63, %v339_v46 }
 0x156   : > { %v787_v59 = vld [vmem:[#allocation2 + $0xc0] sm:$0xff]  ;;  %1000 = vst.msk [vmem:[%s2151_s22 + $0x14] sm:$0xf] %vm994_vm1, %v1518_v47  ;;  %1016 = vst.msk [vmem:[%s2151_s22 + $0x54] sm:$0xf] %vm994_vm1, %v1534_v48  ;;  %v810_v0 = vadd.f32 %v2132_v53, %v771_v58  ;;  %v774_v2 = vld [vmem:[#allocation2 + $0x58] sm:$0xff] }
 0x157   : > { %v826_v1 = vadd.f32 %v2132_v53, %v787_v59  ;;  %v790_v3 = vld [vmem:[#allocation2 + $0xd8] sm:$0xff]  ;;  %740 = vst.msk [vmem:[#allocation2 + $0x60] sm:$0xff] %vm277_vm0, %v707_v51  ;;  %756 = vst.msk [vmem:[#allocation2 + $0xe0] sm:$0xff] %vm277_vm0, %v723_v52  ;;  %v844_v6 = vmax.f32 %v812_v56, 0.0  ;;  %v860_v7 = vmax.f32 %v828_v57, 0.0  ;;  %v813_v8 = vadd.f32 %v2132_v53, %v774_v2  ;;  %v772_v10 = vld [vmem:[#allocation2 + $0x48] sm:$0xff] }
 0x158   : > { %v829_v9 = vadd.f32 %v2132_v53, %v790_v3  ;;  %v788_v11 = vld [vmem:[#allocation2 + $0xc8] sm:$0xff]  ;;  %743 = vst.msk [vmem:[#allocation2 + $0x78] sm:$0xff] %vm277_vm0, %v710_v60  ;;  %759 = vst.msk [vmem:[#allocation2 + $0xf8] sm:$0xff] %vm277_vm0, %v726_v61  ;;  %v842_v12 = vmax.f32 %v810_v0, 0.0  ;;  %v811_v14 = vadd.f32 %v2132_v53, %v772_v10 }
 0x159   : > { %v858_v13 = vmax.f32 %v826_v1, 0.0  ;;  %v827_v15 = vadd.f32 %v2132_v53, %v788_v11  ;;  %741 = vst.msk [vmem:[#allocation2 + $0x68] sm:$0xff] %vm277_vm0, %v708_v4  ;;  %757 = vst.msk [vmem:[#allocation2 + $0xe8] sm:$0xff] %vm277_vm0, %v724_v5  ;;  %v1523_v16 = vpack.c.bf16 %v844_v6, %v844_v6  ;;  %v1539_v17 = vpack.c.bf16 %v860_v7, %v860_v7 }
 0x15a   : > { %v845_v18 = vmax.f32 %v813_v8, 0.0  ;;  %v861_v19 = vmax.f32 %v829_v9, 0.0  ;;  %v1521_v20 = vpack.c.bf16 %v842_v12, %v842_v12  ;;  %v843_v22 = vmax.f32 %v811_v14, 0.0 }
 0x15b   : > { %v1537_v21 = vpack.c.bf16 %v858_v13, %v858_v13  ;;  %v859_v23 = vmax.f32 %v827_v15, 0.0  ;;  %1005 = vst.msk [vmem:[%s2151_s22 + $0x28] sm:$0xf] %vm994_vm1, %v1523_v16  ;;  %1021 = vst.msk [vmem:[%s2151_s22 + $0x68] sm:$0xf] %vm994_vm1, %v1539_v17 }
 0x15c   : > { %v1524_v24 = vpack.c.bf16 %v845_v18, %v845_v18  ;;  %v1540_v25 = vpack.c.bf16 %v861_v19, %v861_v19  ;;  %1003 = vst.msk [vmem:[%s2151_s22 + $0x20] sm:$0xf] %vm994_vm1, %v1521_v20  ;;  %v1522_v26 = vpack.c.bf16 %v843_v22, %v843_v22  ;;  %v777_v28 = vld [vmem:[#allocation2 + $0x70] sm:$0xff] }
 0x15d   : > { %1019 = vst.msk [vmem:[%s2151_s22 + $0x60] sm:$0xf] %vm994_vm1, %v1537_v21  ;;  %v1538_v27 = vpack.c.bf16 %v859_v23, %v859_v23  ;;  %v793_v29 = vld [vmem:[#allocation2 + $0xf0] sm:$0xff]  ;;  %v816_v30 = vadd.f32 %v2132_v53, %v777_v28 }
 0x15e   : > { %1006 = vst.msk [vmem:[%s2151_s22 + $0x2c] sm:$0xf] %vm994_vm1, %v1524_v24  ;;  %1022 = vst.msk [vmem:[%s2151_s22 + $0x6c] sm:$0xf] %vm994_vm1, %v1540_v25  ;;  %v832_v31 = vadd.f32 %v2132_v53, %v793_v29  ;;  %v775_v32 = vld [vmem:[#allocation2 + $0x60] sm:$0xff] }
 0x15f   : > { %v791_v33 = vld [vmem:[#allocation2 + $0xe0] sm:$0xff]  ;;  %1004 = vst.msk [vmem:[%s2151_s22 + $0x24] sm:$0xf] %vm994_vm1, %v1522_v26  ;;  %1020 = vst.msk [vmem:[%s2151_s22 + $0x64] sm:$0xf] %vm994_vm1, %v1538_v27  ;;  %v814_v34 = vadd.f32 %v2132_v53, %v775_v32  ;;  %v778_v36 = vld [vmem:[#allocation2 + $0x78] sm:$0xff] }
 0x160   : > { %v830_v35 = vadd.f32 %v2132_v53, %v791_v33  ;;  %v794_v37 = vld [vmem:[#allocation2 + $0xf8] sm:$0xff]  ;;  %v848_v38 = vmax.f32 %v816_v30, 0.0  ;;  %v864_v39 = vmax.f32 %v832_v31, 0.0  ;;  %v817_v40 = vadd.f32 %v2132_v53, %v778_v36  ;;  %v776_v42 = vld [vmem:[#allocation2 + $0x68] sm:$0xff] }
 0x161   : > { %v833_v41 = vadd.f32 %v2132_v53, %v794_v37  ;;  %v792_v43 = vld [vmem:[#allocation2 + $0xe8] sm:$0xff]  ;;  %v846_v44 = vmax.f32 %v814_v34, 0.0  ;;  %v815_v46 = vadd.f32 %v2132_v53, %v776_v42 }
 0x162   : > { %v862_v45 = vmax.f32 %v830_v35, 0.0  ;;  %v831_v47 = vadd.f32 %v2132_v53, %v792_v43  ;;  %v1527_v48 = vpack.c.bf16 %v848_v38, %v848_v38  ;;  %v1543_v49 = vpack.c.bf16 %v864_v39, %v864_v39  ;;  %1033 = sbr.rel (!%p1990_p9) target bundleno = 431 (0x1af), region = 48 }
 0x163   : > { %v849_v50 = vmax.f32 %v817_v40, 0.0  ;;  %v865_v51 = vmax.f32 %v833_v41, 0.0  ;;  %v1525_v52 = vpack.c.bf16 %v846_v44, %v846_v44  ;;  %v847_v55 = vmax.f32 %v815_v46, 0.0 }
 0x164   : > { %v1541_v54 = vpack.c.bf16 %v862_v45, %v862_v45  ;;  %v863_v56 = vmax.f32 %v831_v47, 0.0  ;;  %1009 = vst.msk [vmem:[%s2151_s22 + $0x38] sm:$0xf] %vm994_vm1, %v1527_v48  ;;  %1025 = vst.msk [vmem:[%s2151_s22 + $0x78] sm:$0xf] %vm994_vm1, %v1543_v49 }
 0x165   : > { %v1528_v57 = vpack.c.bf16 %v849_v50, %v849_v50  ;;  %v1544_v58 = vpack.c.bf16 %v865_v51, %v865_v51  ;;  %1007 = vst.msk [vmem:[%s2151_s22 + $0x30] sm:$0xf] %vm994_vm1, %v1525_v52  ;;  %v1526_v53 = vpack.c.bf16 %v847_v55, %v847_v55 }
 0x166   : > { %1023 = vst.msk [vmem:[%s2151_s22 + $0x70] sm:$0xf] %vm994_vm1, %v1541_v54  ;;  %v1542_v59 = vpack.c.bf16 %v863_v56, %v863_v56 }
 0x167   : > { %1010 = vst.msk [vmem:[%s2151_s22 + $0x3c] sm:$0xf] %vm994_vm1, %v1528_v57  ;;  %1026 = vst.msk [vmem:[%s2151_s22 + $0x7c] sm:$0xf] %vm994_vm1, %v1544_v58 }
 0x168   : > { %1008 = vst.msk [vmem:[%s2151_s22 + $0x34] sm:$0xf] %vm994_vm1, %v1526_v53  ;;  %1024 = vst.msk [vmem:[%s2151_s22 + $0x74] sm:$0xf] %vm994_vm1, %v1542_v59 }
 0x169   : > { %s2419_s4 = smov (!%p1036_p8, %s1035_s4), 32 }
 0x16a   : > { %s1497_s20 = sshll.u32 %s2419_s4, 6 }
 0x16b   : > { %p1500_p12 = scmp.eq.s32.totalorder %s1497_s20, 0 }
 0x16c   : > { %s2270_s24 = sshrl.u32 (!%p1500_p12), %s2419_s4, 5 }
 0x16d   : > { %1045 = sbr.rel (%p1500_p12) target bundleno = 431 (0x1af), region = 52  ;;  %p1501_p9 = scmp.le.s32.totalorder (!%p1500_p12), %s2270_s24, 0 }
 0x174   : > { %1346 = sbr.rel (%p1501_p9) target bundleno = 410 (0x19a), region = 136  ;;  %s2406_s15 = smov (!%p1501_p9), %s2264_s18 }
 0x175   : > { %s2407_s21 = smov (!%p1501_p9), %s2151_s22  ;;  %s2279_s25 = smov (!%p1501_p9), 0  }
 0x176   : > { %s2281_s26 = smov (!%p1501_p9), 0  }
 0x17b LB: >> { %v1061_v60 = vld [vmem:[%s1894_s21] sm:$0xf]  ;;  %v1063_v61 = vld [vmem:[%s1894_s21 + $0x4] sm:$0xf]  ;;  %v1065_v62 = vld [vmem:[%s1894_s21 + $0x8] sm:$0xf]  ;;  %s1902_s26 = sphi %s2281_s26, %s1055_s26   ;;  %s1898_s25 = sphi %s2279_s25, %s2408_s25   ;;  %s1894_s21 = sphi %s2407_s21, %s1130_s21   ;;  %s1890_s15 = sphi %s2406_s15, %s1131_s15  }
 0x17c   : >> { %1062 = vst [vmem:[%s1890_s15] sm:$0xf] %v1061_v60  ;;  %1064 = vst [vmem:[%s1890_s15 + $0x4] sm:$0xf] %v1063_v61  ;;  %v1067_v63 = vld [vmem:[%s1894_s21 + $0xc] sm:$0xf]  ;;  %s1125_s27 = sadd.s32 1, %s1898_s25 }
 0x17d   : >> { %1066 = vst [vmem:[%s1890_s15 + $0x8] sm:$0xf] %v1065_v62  ;;  %v1069_v0 = vld [vmem:[%s1894_s21 + $0x10] sm:$0xf]  ;;  %v1071_v1 = vld [vmem:[%s1894_s21 + $0x14] sm:$0xf]  ;;  %p1126_p7 = scmp.ge.s32.totalorder %s1125_s27, %s2270_s24 }
 0x17e   : >> { %1068 = vst [vmem:[%s1890_s15 + $0xc] sm:$0xf] %v1067_v63  ;;  %1070 = vst [vmem:[%s1890_s15 + $0x10] sm:$0xf] %v1069_v0  ;;  %v1073_v2 = vld [vmem:[%s1894_s21 + $0x18] sm:$0xf] }
 0x17f   : >> { %1072 = vst [vmem:[%s1890_s15 + $0x14] sm:$0xf] %v1071_v1  ;;  %v1075_v3 = vld [vmem:[%s1894_s21 + $0x1c] sm:$0xf]  ;;  %v1077_v4 = vld [vmem:[%s1894_s21 + $0x20] sm:$0xf] }
 0x180   : >> { %1074 = vst [vmem:[%s1890_s15 + $0x18] sm:$0xf] %v1073_v2  ;;  %1076 = vst [vmem:[%s1890_s15 + $0x1c] sm:$0xf] %v1075_v3  ;;  %v1079_v5 = vld [vmem:[%s1894_s21 + $0x24] sm:$0xf] }
 0x181   : >> { %1078 = vst [vmem:[%s1890_s15 + $0x20] sm:$0xf] %v1077_v4  ;;  %v1081_v6 = vld [vmem:[%s1894_s21 + $0x28] sm:$0xf]  ;;  %v1083_v7 = vld [vmem:[%s1894_s21 + $0x2c] sm:$0xf] }
 0x182   : >> { %1080 = vst [vmem:[%s1890_s15 + $0x24] sm:$0xf] %v1079_v5  ;;  %1082 = vst [vmem:[%s1890_s15 + $0x28] sm:$0xf] %v1081_v6  ;;  %v1085_v8 = vld [vmem:[%s1894_s21 + $0x30] sm:$0xf] }
 0x183   : >> { %1084 = vst [vmem:[%s1890_s15 + $0x2c] sm:$0xf] %v1083_v7  ;;  %v1087_v9 = vld [vmem:[%s1894_s21 + $0x34] sm:$0xf]  ;;  %v1089_v10 = vld [vmem:[%s1894_s21 + $0x38] sm:$0xf] }
 0x184   : >> { %1086 = vst [vmem:[%s1890_s15 + $0x30] sm:$0xf] %v1085_v8  ;;  %1088 = vst [vmem:[%s1890_s15 + $0x34] sm:$0xf] %v1087_v9  ;;  %v1091_v11 = vld [vmem:[%s1894_s21 + $0x3c] sm:$0xf] }
 0x185   : >> { %1090 = vst [vmem:[%s1890_s15 + $0x38] sm:$0xf] %v1089_v10  ;;  %v1093_v12 = vld [vmem:[%s1894_s21 + $0x40] sm:$0xf]  ;;  %v1095_v13 = vld [vmem:[%s1894_s21 + $0x44] sm:$0xf] }
 0x186   : >> { %1092 = vst [vmem:[%s1890_s15 + $0x3c] sm:$0xf] %v1091_v11  ;;  %1094 = vst [vmem:[%s1890_s15 + $0x40] sm:$0xf] %v1093_v12  ;;  %v1097_v14 = vld [vmem:[%s1894_s21 + $0x48] sm:$0xf] }
 0x187   : >> { %1096 = vst [vmem:[%s1890_s15 + $0x44] sm:$0xf] %v1095_v13  ;;  %v1099_v15 = vld [vmem:[%s1894_s21 + $0x4c] sm:$0xf]  ;;  %v1101_v16 = vld [vmem:[%s1894_s21 + $0x50] sm:$0xf] }
 0x188   : >> { %1098 = vst [vmem:[%s1890_s15 + $0x48] sm:$0xf] %v1097_v14  ;;  %1100 = vst [vmem:[%s1890_s15 + $0x4c] sm:$0xf] %v1099_v15  ;;  %v1103_v17 = vld [vmem:[%s1894_s21 + $0x54] sm:$0xf] }
 0x189   : >> { %1102 = vst [vmem:[%s1890_s15 + $0x50] sm:$0xf] %v1101_v16  ;;  %v1105_v18 = vld [vmem:[%s1894_s21 + $0x58] sm:$0xf]  ;;  %v1107_v19 = vld [vmem:[%s1894_s21 + $0x5c] sm:$0xf] }
 0x18a   : >> { %1104 = vst [vmem:[%s1890_s15 + $0x54] sm:$0xf] %v1103_v17  ;;  %1106 = vst [vmem:[%s1890_s15 + $0x58] sm:$0xf] %v1105_v18  ;;  %v1109_v20 = vld [vmem:[%s1894_s21 + $0x60] sm:$0xf] }
 0x18b   : >> { %1108 = vst [vmem:[%s1890_s15 + $0x5c] sm:$0xf] %v1107_v19  ;;  %v1111_v21 = vld [vmem:[%s1894_s21 + $0x64] sm:$0xf]  ;;  %v1113_v22 = vld [vmem:[%s1894_s21 + $0x68] sm:$0xf] }
 0x18c   : >> { %1110 = vst [vmem:[%s1890_s15 + $0x60] sm:$0xf] %v1109_v20  ;;  %1112 = vst [vmem:[%s1890_s15 + $0x64] sm:$0xf] %v1111_v21  ;;  %v1115_v23 = vld [vmem:[%s1894_s21 + $0x6c] sm:$0xf] }
 0x18d   : >> { %1114 = vst [vmem:[%s1890_s15 + $0x68] sm:$0xf] %v1113_v22  ;;  %v1117_v24 = vld [vmem:[%s1894_s21 + $0x70] sm:$0xf]  ;;  %v1119_v25 = vld [vmem:[%s1894_s21 + $0x74] sm:$0xf] }
 0x18e   : >> { %1116 = vst [vmem:[%s1890_s15 + $0x6c] sm:$0xf] %v1115_v23  ;;  %1118 = vst [vmem:[%s1890_s15 + $0x70] sm:$0xf] %v1117_v24  ;;  %v1121_v26 = vld [vmem:[%s1894_s21 + $0x78] sm:$0xf] }
 0x18f   : >> { %1120 = vst [vmem:[%s1890_s15 + $0x74] sm:$0xf] %v1119_v25  ;;  %v1123_v27 = vld [vmem:[%s1894_s21 + $0x7c] sm:$0xf]  ;;  %1122 = vst [vmem:[%s1890_s15 + $0x78] sm:$0xf] %v1121_v26 }
 0x190   : >> { %1124 = vst [vmem:[%s1890_s15 + $0x7c] sm:$0xf] %v1123_v27  ;;  %s2421_s27 = smov (%p1126_p7, %s1125_s27), 0  ;;  %s1055_s26 = sadd.s32 1, %s1902_s26  }
 0x191   : >> { %s1502_s28 = sshll.u32 %s2421_s27, 7  ;;  %p1054_p10 = scmp.ge.s32.totalorder %s1055_s26, %s2270_s24 }
 0x192   : >> { %s1130_s21 = scalar_lea.vmem %s2151_s22, %s1502_s28 [#allocation5]   ;;  %s1131_s15 = scalar_lea.vmem %s2264_s18, %s1502_s28  }
 0x193   : >> { %s2408_s25 = smov %s2421_s27  ;;  %1057 = sbr.rel (!%p1054_p10) target bundleno = 379 (0x17b), region = 142 }
 0x19a PF: > { %s2374_s30 = sand.u32 31, %s2419_s4   ;;  %s1546_s5 = sshll.u32 %s2270_s24, 7 }
 0x19b   : > { %s1136_s6 = scalar_lea.vmem %s2151_s22, %s1546_s5 [#allocation5]   ;;  %s1138_s7 = scalar_lea.vmem %s2264_s18, %s1546_s5  }
 0x19c   : > { %p1507_p11 = scmp.le.s32.totalorder %s2374_s30, 0 }
 0x19d   : > { %s1904_s11 = smov (!%p1507_p11), %s1138_s7   ;;  %s1908_s12 = smov (!%p1507_p11), %s1136_s6  }
 0x19e   : > { %1360 = sbr.rel (%p1507_p11) target bundleno = 431 (0x1af), region = 147  ;;  %s1912_s8 = smov (!%p1507_p11), 0  }
 0x19f   : > { %s1916_s29 = smov (!%p1507_p11), 0  }
 0x1a5 LB: >> { %v1148_v28 = vld [vmem:[%s1910_s12] sm:$0xf]  ;;  %s1150_s4 = sadd.s32 1, %s1914_s8  ;;  %s1142_s29 = sadd.s32 1, %s1918_s29   ;;  %s1918_s29 = sphi %s1916_s29, %s1142_s29   ;;  %s1914_s8 = sphi %s1912_s8, %s1913_s8   ;;  %s1910_s12 = sphi %s1908_s12, %s1155_s12   ;;  %s1906_s11 = sphi %s1904_s11, %s1156_s11  }
 0x1a6   : >> { %1149 = vst [vmem:[%s1906_s11] sm:$0xf] %v1148_v28  ;;  %p1151_p13 = scmp.ge.s32.totalorder %s1150_s4, %s2374_s30  ;;  %p1141_p0 = scmp.ge.s32.totalorder %s1142_s29, %s2374_s30 }
 0x1a8   : >> { %s2423_s4 = smov (%p1151_p13, %s1150_s4), 0  ;;  %1144 = sbr.rel (!%p1141_p0) target bundleno = 421 (0x1a5), region = 153 }
 0x1a9   : >> { %s1508_s22 = sshll.u32 %s2423_s4, 2  ;;  %s1913_s8 = smov %s2423_s4  }
 0x1aa   : >> { %s1155_s12 = scalar_lea.vmem %s1136_s6, %s1508_s22 [#allocation5]   ;;  %s1156_s11 = scalar_lea.vmem %s1138_s7, %s1508_s22  }
 0x1af PF: > { %s16_s17 = sadd.s32 1, %s1886_s17   ;;  %s2409_s12 = smov %s1870_s13 }
 0x1b0   : > { %p13_p2 = scmp.ge.s32.totalorder %s16_s17, 13   ;;  %s2410_s13 = smov %s1874_s14 }
 0x1b1   : > { %s2411_s14 = smov %s1988_s23  ;;  %s2412_s15 = smov %s1882_s16 }
 0x1b2   : > { %s2413_s16 = smov %s2415_s19  ;;  %15 = sbr.rel (!%p13_p2) target bundleno = 4 (0x4), region = 164 }
 0x1b9   :  { %1279 = vsyncpa [#allocation4], 1 }
 0x1ba   :  { %1281 = vsyncpa [#allocation4 + $0x1], 1 }

</bundles_post_ra>
